<compile_context>
chip_gen: v7x
topology: tpu7x:2x2x1
jax: 0.10.0
libtpu: 0.0.40
codegen_flags: <defaults>
</compile_context>

<pallas_src>
import functools

import jax
import jax.numpy as jnp
from jax import lax
from jax.experimental import pallas as pl
from jax.experimental.pallas import tpu as pltpu


def _round_up(x, m):
    return (x + m - 1) // m * m


def _vmem_limit_bytes():
    # Per-generation scoped-VMEM budget: physical capacity minus headroom, capped.
    try:
        cap = pltpu.get_tpu_info().vmem_capacity_bytes
    except Exception:
        cap = 64 * 1024 * 1024
    return int(min(max(cap - 16 * 1024 * 1024, 32 * 1024 * 1024), 100 * 1024 * 1024))


def _prefer_k256():
    # v6e/v7x MXUs are 256 deep for bf16 -> pack two K=128 taps per dot.
    # <=v5 (128-deep MXU) gains nothing and would pay the dummy-tap padding.
    try:
        kind = jax.devices()[0].device_kind.lower()
    except Exception:
        return True
    return not any(v in kind for v in ("v2", "v3", "v4", "v5"))


def _pick_row_tile(hout, plane_row_w, bytes_per_image_row, budget, align8):
    """Largest divisor `th` of hout whose tile fits `budget`; when align8, th*plane_row_w
    must be a multiple of 8 (full-extent tiles are exempt from the (8,128) rule)."""
    cands = []
    for th in range(1, hout + 1):
        if hout % th:
            continue
        if align8 and th != hout and (th * plane_row_w) % 8 != 0:
            continue
        cands.append(th)
    fit = [th for th in cands if th * bytes_per_image_row <= budget]
    return max(fit) if fit else min(cands)


# ----------------------------------------------------------------------------
# Kernel 1a (tap path, Cin >= 128): conv as shifted MXU matmuls over a flattened
# reflect-padded plane (whole-sample resident), row-tiled output, fused batch stats.
# ----------------------------------------------------------------------------
def _conv_stats_kernel(x_ref, w_ref, y_ref, stats_ref, *, group_offsets, tm, wrow, wout):
    # x_ref:     (1, R_in, Cin_pad)        bf16  whole padded plane (resident across row tiles)
    # w_ref:     (G, Kg, Cout_pad)         bf16  Kg = Cin_pad or 2*Cin_pad (K=256 tap packing)
    # y_ref:     (1, tm, Cout_pad)         bf16  tm = th * Wrow output-plane rows
    # stats_ref: (1, 1, 8, Cout_pad)       f32   row0 = sum, row1 = sum of squares (masked)
    base = pl.multiple_of(pl.program_id(1) * tm, 8)
    acc = None
    for g, offs in enumerate(group_offsets):
        if len(offs) == 1:
            xs = x_ref[0, pl.ds(base + offs[0], tm), :]
        else:
            xs = jnp.concatenate(
                [x_ref[0, pl.ds(base + o, tm), :] for o in offs], axis=-1)
        part = jnp.dot(xs, w_ref[g], preferred_element_type=jnp.float32)
        acc = part if acc is None else acc + part

    y_ref[0] = acc.astype(y_ref.dtype)            # single store of the tile

    # Columns [Wout, Wrow) of each Wrow-wide output row are wrap/zero-pad garbage
    # (compacted away in kernel 2) -> exclude them from the BN statistics.
    cols = lax.broadcasted_iota(jnp.int32, (tm, 1), 0) % wrow
    mask = (cols < wout).astype(jnp.float32)
    yv = acc * mask
    s = jnp.sum(yv, axis=0, keepdims=True)
    ss = jnp.sum(yv * acc, axis=0, keepdims=True)
    cpad = acc.shape[1]
    stats_ref[0, 0] = jnp.concatenate(
        [s, ss, jnp.zeros((6, cpad), jnp.float32)], axis=0)


# ----------------------------------------------------------------------------
# Kernel 1b (im2col path, small Cin first layer): one dot per row tile + fused stats.
# ----------------------------------------------------------------------------
def _matmul_stats_kernel(x_ref, w_ref, y_ref, stats_ref):
    # x_ref: (1, tm, K_pad) bf16   w_ref: (K_pad, Cout_pad) bf16
    # y_ref: (1, tm, Cout_pad) bf16   stats_ref: (1, 1, 8, Cout_pad) f32
    acc = jnp.dot(x_ref[0], w_ref[...], preferred_element_type=jnp.float32)
    y_ref[0] = acc.astype(y_ref.dtype)
    s = jnp.sum(acc, axis=0, keepdims=True)
    ss = jnp.sum(acc * acc, axis=0, keepdims=True)
    cpad = acc.shape[1]
    stats_ref[0, 0] = jnp.concatenate(
        [s, ss, jnp.zeros((6, cpad), jnp.float32)], axis=0)


# ----------------------------------------------------------------------------
# Kernel 2: BatchNorm affine (scale/shift folded in glue) + optional ReLU, with the
# Wrow->Wout compaction and channel slice folded into the store (bf16 in / bf16 out).
# ----------------------------------------------------------------------------
def _bn_act_kernel(y_ref, scale_ref, shift_ref, o_ref, *, relu, wout, cout):
    # y_ref: (1, th, Wsrc, Cout_pad) bf16   scale/shift: (1, Cout_pad) f32
    # o_ref: (1, th, Wout, Cout)
    v = y_ref[0, :, :wout, :].astype(jnp.float32)
    v = v * scale_ref[0] + shift_ref[0]
    if relu:
        v = jnp.maximum(v, 0.0)
    o_ref[0] = v[:, :, :cout].astype(o_ref.dtype)


# ----------------------------------------------------------------------------
# CBR2d forward, channels-last (NHWC).  Hot paths in Pallas, layout plumbing in XLA.
# ----------------------------------------------------------------------------
@functools.partial(jax.jit,
                   static_argnames=("padding", "eps", "use_activation", "out_dtype"))
def cbr2d_nhwc(x, w, gamma, beta, *, padding=1, eps=1e-5, use_activation=True,
               out_dtype=jnp.bfloat16):
    """x: (N, H, W, Cin).  w: (Cout, Cin, kh, kw).  gamma/beta: (Cout,).

    Conv2d(stride=1, dilation=1, groups=1, padding_mode='reflect') -> BatchNorm2d
    (training-mode batch statistics) -> optional ReLU.  Returns NHWC `out_dtype`.
    The conv bias is omitted in-kernel (train-mode BN cancels it exactly).
    """
    N, H, W, Cin = x.shape
    Cout, Cin_w, kh, kw = w.shape
    assert Cin_w == Cin
    p = padding
    Hp, Wp = H + 2 * p, W + 2 * p
    Hout, Wout = Hp - kh + 1, Wp - kw + 1
    cout_pad = _round_up(Cout, 128)
    vmem_limit = _vmem_limit_bytes()
    obytes = jnp.dtype(out_dtype).itemsize

    xp = jnp.pad(x, ((0, 0), (p, p), (p, p), (0, 0)), mode="reflect")

    if Cin <= 32:
        # ---------------- im2col path (e.g. the Cin=4 first layer) ----------------
        K = kh * kw * Cin
        k_pad = _round_up(K, 128)
        cols = [xp[:, i:i + Hout, j:j + Wout, :] for i in range(kh) for j in range(kw)]
        patches = jnp.concatenate(cols, axis=-1)                       # (N,Hout,Wout,K)
        patches = jnp.pad(patches, ((0, 0), (0, 0), (0, 0), (0, k_pad - K)))
        patches = patches.reshape(N, Hout * Wout, k_pad).astype(jnp.bfloat16)

        wm = jnp.transpose(w, (2, 3, 1, 0)).reshape(K, Cout)
        wm = jnp.pad(wm, ((0, k_pad - K), (0, cout_pad - Cout))).astype(jnp.bfloat16)

        per_row = Wout * (2 * k_pad * 2 + 2 * cout_pad * 2 + cout_pad * 4)
        th1 = _pick_row_tile(Hout, Wout, per_row, 8 << 20, align8=True)
        tm = th1 * Wout
        n_tiles = Hout // th1

        y, stats = pl.pallas_call(
            _matmul_stats_kernel,
            out_shape=(jax.ShapeDtypeStruct((N, Hout * Wout, cout_pad), jnp.bfloat16),
                       jax.ShapeDtypeStruct((N, n_tiles, 8, cout_pad), jnp.float32)),
            grid_spec=pltpu.PrefetchScalarGridSpec(
                num_scalar_prefetch=0,
                grid=(N, n_tiles),
                in_specs=[
                    pl.BlockSpec((1, tm, k_pad), lambda n, r: (n, r, 0)),
                    pl.BlockSpec((k_pad, cout_pad), lambda n, r: (0, 0)),
                ],
                out_specs=[
                    pl.BlockSpec((1, tm, cout_pad), lambda n, r: (n, r, 0)),
                    pl.BlockSpec((1, 1, 8, cout_pad), lambda n, r: (n, r, 0, 0)),
                ]),
            compiler_params=pltpu.CompilerParams(
                dimension_semantics=("parallel", "parallel"),
                vmem_limit_bytes=vmem_limit),
        )(patches, wm)
        w_src = Wout
    else:
        # ---------------- shifted-tap path (Cin >= 128 layers) ----------------
        cin_pad = _round_up(Cin, 128)
        wrow = _round_up(Wp, 8)                 # sublane-aligned kh tap offsets
        r_plane = Hp * wrow
        r_in = _round_up(r_plane + (kh - 1) * wrow + (kw - 1), 8)
        T = kh * kw
        offsets = tuple(i * wrow + j for i in range(kh) for j in range(kw))

        xw = jnp.pad(xp, ((0, 0), (0, 0), (0, wrow - Wp), (0, cin_pad - Cin)))
        x2d = xw.reshape(N, r_plane, cin_pad)
        x2d = jnp.pad(x2d, ((0, 0), (0, r_in - r_plane), (0, 0))).astype(jnp.bfloat16)

        wt = jnp.transpose(w, (2, 3, 1, 0)).reshape(T, Cin, Cout)
        wt = jnp.pad(wt, ((0, 0), (0, cin_pad - Cin), (0, cout_pad - Cout)))

        pair = (cin_pad == 128) and _prefer_k256()
        if pair:
            n_groups = (T + 1) // 2
            offs = offsets
            if T % 2:
                wt = jnp.concatenate(
                    [wt, jnp.zeros((1, cin_pad, cout_pad), wt.dtype)], axis=0)
                offs = offsets + (0,)           # dummy tap: in-bounds slice x zero weights
            wt = wt.reshape(n_groups, 2 * cin_pad, cout_pad)
            group_offsets = tuple((offs[2 * g], offs[2 * g + 1]) for g in range(n_groups))
            kg = 2 * cin_pad
        else:
            n_groups = T
            group_offsets = tuple((o,) for o in offsets)
            kg = cin_pad
        wt = wt.astype(jnp.bfloat16)

        per_row = wrow * (2 * cout_pad * 2 + cout_pad * 4)
        th1 = _pick_row_tile(Hout, wrow, per_row, 6 << 20, align8=False)
        tm = th1 * wrow
        n_tiles = Hout // th1

        kern = functools.partial(_conv_stats_kernel, group_offsets=group_offsets,
                                 tm=tm, wrow=wrow, wout=Wout)
        y, stats = pl.pallas_call(
            kern,
            out_shape=(jax.ShapeDtypeStruct((N, Hout * wrow, cout_pad), jnp.bfloat16),
                       jax.ShapeDtypeStruct((N, n_tiles, 8, cout_pad), jnp.float32)),
            grid_spec=pltpu.PrefetchScalarGridSpec(
                num_scalar_prefetch=0,
                grid=(N, n_tiles),
                in_specs=[
                    pl.BlockSpec((1, r_in, cin_pad), lambda n, r: (n, 0, 0)),
                    pl.BlockSpec((n_groups, kg, cout_pad), lambda n, r: (0, 0, 0)),
                ],
                out_specs=[
                    pl.BlockSpec((1, tm, cout_pad), lambda n, r: (n, r, 0)),
                    pl.BlockSpec((1, 1, 8, cout_pad), lambda n, r: (n, r, 0, 0)),
                ]),
            compiler_params=pltpu.CompilerParams(
                dimension_semantics=("parallel", "parallel"),
                vmem_limit_bytes=vmem_limit),
        )(x2d, wt)
        w_src = wrow

    # BatchNorm2d (training mode): biased batch variance over (N, Hout, Wout).
    count = N * Hout * Wout
    s = jnp.sum(stats[:, :, 0, :], axis=(0, 1))
    ss = jnp.sum(stats[:, :, 1, :], axis=(0, 1))
    mean = s / count
    # TODO(synk): single-pass E[y^2]-mean^2 can cancel for strongly shifted activations at
    # large N*H*W; clamped at 0 here, switch to a shifted/two-pass form if needed.
    var = jnp.maximum(ss / count - mean * mean, 0.0)
    gamma_p = jnp.pad(gamma.astype(jnp.float32), (0, cout_pad - Cout), constant_values=1.0)
    beta_p = jnp.pad(beta.astype(jnp.float32), (0, cout_pad - Cout))
    inv = lax.rsqrt(var + eps)
    scale = (gamma_p * inv).reshape(1, cout_pad)
    shift = (beta_p - mean * gamma_p * inv).reshape(1, cout_pad)
    # TODO(synk): BatchNorm running_mean/running_var buffer updates (eval mode) are not
    # modeled; this forward matches PyTorch training-mode batch statistics.

    y4 = y.reshape(N, Hout, w_src, cout_pad)     # free reshape (row-major view)
    per_row2 = 2 * (w_src * cout_pad * 2) + 2 * (Wout * Cout * obytes)
    th2 = _pick_row_tile(Hout, w_src, per_row2, 8 << 20, align8=False)
    n_tiles2 = Hout // th2

    out = pl.pallas_call(
        functools.partial(_bn_act_kernel, relu=use_activation, wout=Wout, cout=Cout),
        out_shape=jax.ShapeDtypeStruct((N, Hout, Wout, Cout), out_dtype),
        grid_spec=pltpu.PrefetchScalarGridSpec(
            num_scalar_prefetch=0,
            grid=(N, n_tiles2),
            in_specs=[
                pl.BlockSpec((1, th2, w_src, cout_pad), lambda n, t: (n, t, 0, 0)),
                pl.BlockSpec((1, cout_pad), lambda n, t: (0, 0)),
                pl.BlockSpec((1, cout_pad), lambda n, t: (0, 0)),
            ],
            out_specs=pl.BlockSpec((1, th2, Wout, Cout), lambda n, t: (n, t, 0, 0))),
        compiler_params=pltpu.CompilerParams(
            dimension_semantics=("parallel", "parallel"),
            vmem_limit_bytes=vmem_limit),
    )(y4, scale, shift)
    return out


def cbr2d_forward(x, w, b, gamma, beta, *, padding=1, eps=1e-5, use_activation=True):
    """NCHW wrapper matching the PyTorch CBR2d block (f32 in / f32 out at the boundary).

    The conv bias `b` is accepted for API parity but unused: training-mode BatchNorm
    subtracts the batch mean, which cancels a per-channel constant exactly.
    """
    del b
    x_nhwc = jnp.transpose(x, (0, 2, 3, 1))
    y = cbr2d_nhwc(x_nhwc, w, gamma, beta, padding=padding, eps=eps,
                   use_activation=use_activation, out_dtype=jnp.bfloat16)
    return jnp.transpose(y, (0, 3, 1, 2)).astype(jnp.float32)


def maxpool2x2_nhwc(x):
    """SimpleCBR's MaxPool2d((2,2), stride=2) on channels-last activations (XLA glue)."""
    # TODO(synk): could be fused with the BN/ReLU pass of the preceding layer.
    N, H, W, C = x.shape
    return x.reshape(N, H // 2, 2, W // 2, 2, C).max(axis=(2, 4))


# ----------------------------------------------------------------------------
# Pure-JAX reference (conv bias included, train-mode BN), for correctness check.
# ----------------------------------------------------------------------------
def cbr2d_reference(x, w, b, gamma, beta, *, padding=1, eps=1e-5,
                    use_activation=True, conv_dtype=jnp.float32):
    xb = x.astype(conv_dtype)
    wb = w.astype(conv_dtype)
    x_pad = jnp.pad(xb, ((0, 0), (0, 0), (padding, padding), (padding, padding)),
                    mode="reflect")
    y = lax.conv_general_dilated(
        x_pad, wb, window_strides=(1, 1), padding="VALID",
        dimension_numbers=("NCHW", "OIHW", "NCHW"),
        preferred_element_type=jnp.float32)
    y = y + b.reshape(1, -1, 1, 1)
    mean = jnp.mean(y, axis=(0, 2, 3), keepdims=True)
    var = jnp.mean((y - mean) ** 2, axis=(0, 2, 3), keepdims=True)
    y = (y - mean) * lax.rsqrt(var + eps)
    y = y * gamma.reshape(1, -1, 1, 1) + beta.reshape(1, -1, 1, 1)
    if use_activation:
        y = jnp.maximum(y, 0.0)
    return y


if __name__ == "__main__":
    key = jax.random.PRNGKey(0)
    ks = jax.random.split(key, 9)

    # Shapes follow SimpleCBR: CBR2d(in_channels, 128, (3,3), padding=1) -> MaxPool2d(2,2)
    # -> a 128->128 CBR2d (run here with use_activation=False, bottleneck-style variant).
    N, Cin, H, W = 2, 4, 16, 16
    C0 = 128                                  # SimpleCBR channels[0] = 32 * 4

    x = jax.random.normal(ks[0], (N, Cin, H, W), dtype=jnp.float32)
    w1 = jax.random.normal(ks[1], (C0, Cin, 3, 3), dtype=jnp.float32) * 0.1
    b1 = jax.random.normal(ks[2], (C0,), dtype=jnp.float32) * 0.1
    g1 = 1.0 + 0.1 * jax.random.normal(ks[3], (C0,), dtype=jnp.float32)
    be1 = 0.1 * jax.random.normal(ks[4], (C0,), dtype=jnp.float32)
    w2 = jax.random.normal(ks[5], (C0, C0, 3, 3), dtype=jnp.float32) * 0.1
    b2 = jax.random.normal(ks[6], (C0,), dtype=jnp.float32) * 0.1
    g2 = 1.0 + 0.1 * jax.random.normal(ks[7], (C0,), dtype=jnp.float32)
    be2 = 0.1 * jax.random.normal(ks[8], (C0,), dtype=jnp.float32)

    # Pallas path: activations stay channels-last bf16 between layers.
    x_nhwc = jnp.transpose(x, (0, 2, 3, 1))
    h1 = cbr2d_nhwc(x_nhwc, w1, g1, be1, padding=1, use_activation=True)      # im2col path
    h1p = maxpool2x2_nhwc(h1)
    h2 = cbr2d_nhwc(h1p, w2, g2, be2, padding=1, use_activation=False,        # tap path
                    out_dtype=jnp.float32)
    out = jnp.transpose(h2, (0, 3, 1, 2))
    out = jax.block_until_ready(out)
    assert out.shape == (N, C0, H // 2, W // 2), out.shape

    # NCHW wrapper smoke-check (same compiled kernels, just boundary transposes/casts).
    out1 = jnp.transpose(h1.astype(jnp.float32), (0, 3, 1, 2))
    out_api = cbr2d_forward(x, w1, b1, g1, be1, padding=1, use_activation=True)
    assert jnp.allclose(out_api, out1), float(jnp.max(jnp.abs(out_api - out1)))

    def q(a):  # bf16 round-trip, matching the kernels' inter-layer storage precision
        return a.astype(jnp.bfloat16).astype(jnp.float32)

    # Layer 1 against a reference using the same MXU precision (bf16 operands, f32 acc),
    # with the reference output quantized to bf16 like the kernel's stored activation.
    r1 = cbr2d_reference(x, w1, b1, g1, be1, padding=1, use_activation=True,
                         conv_dtype=jnp.bfloat16)
    err1 = float(jnp.max(jnp.abs(out1 - q(r1))))
    assert err1 < 7.5e-2, err1
    assert float(jnp.mean(jnp.abs(out1 - q(r1)))) < 2e-2

    # Two-layer chain against the bf16-conv reference chain (bf16 inter-layer activation).
    r1p = jnp.transpose(maxpool2x2_nhwc(jnp.transpose(q(r1), (0, 2, 3, 1))), (0, 3, 1, 2))
    r2 = cbr2d_reference(r1p, w2, b2, g2, be2, padding=1, use_activation=False,
                         conv_dtype=jnp.bfloat16)
    err2 = float(jnp.max(jnp.abs(out - r2)))
    assert jnp.allclose(out, r2, rtol=5e-2, atol=1e-1), err2
    assert float(jnp.mean(jnp.abs(out - r2))) < 3e-2

    # Loose sanity check of the first block against a full-f32 reference
    # (bounds the bf16-operand / bf16-storage error of the Pallas path).
    r1_f32 = cbr2d_reference(x, w1, b1, g1, be1, padding=1, use_activation=True,
                             conv_dtype=jnp.float32)
    err32 = float(jnp.max(jnp.abs(out1 - r1_f32)))
    assert jnp.allclose(out1, r1_f32, rtol=1e-1, atol=1e-1), err32

    print("KERNEL_OK")
</pallas_src>

<mosaic_0001>
module attributes {stable_mosaic.version = 11 : i64} {
  func.func @_matmul_stats_kernel(%arg0: i32, %arg1: i32, %arg2: memref<1x256x128xbf16, #tpu.memory_space<vmem>>, %arg3: memref<128x128xbf16, #tpu.memory_space<vmem>>, %arg4: memref<1x256x128xbf16, #tpu.memory_space<vmem>>, %arg5: memref<1x1x8x128xf32, #tpu.memory_space<vmem>>) attributes {dimension_semantics = [#tpu.dimension_semantics<parallel>, #tpu.dimension_semantics<parallel>], iteration_bounds = array<i64: 2, 1>, scalar_prefetch = 0 : i64, scratch_operands = 0 : i64, tpu.core_type = #tpu.core_type<tc>, window_params = [{transform_indices = @transform_0, window_bounds = array<i64: 1, 256, 128>}, {pipeline_mode = #tpu.pipeline_mode<synchronous>, transform_indices = @transform_1, window_bounds = array<i64: 128, 128>}, {transform_indices = @transform_2, window_bounds = array<i64: 1, 256, 128>}, {transform_indices = @transform_3, window_bounds = array<i64: 1, 1, 8, 128>}]} {
    %c0 = arith.constant 0 : index
    %c0_0 = arith.constant 0 : index
    %c0_1 = arith.constant 0 : index
    %0 = vector.load %arg2[%c0, %c0_0, %c0_1] : memref<1x256x128xbf16, #tpu.memory_space<vmem>>, vector<1x256x128xbf16>
    %1 = vector.shape_cast %0 : vector<1x256x128xbf16> to vector<256x128xbf16>
    %c0_2 = arith.constant 0 : index
    %c0_3 = arith.constant 0 : index
    %2 = vector.load %arg3[%c0_2, %c0_3] : memref<128x128xbf16, #tpu.memory_space<vmem>>, vector<128x128xbf16>
    %cst = arith.constant dense<0.000000e+00> : vector<256x128xf32>
    %3 = tpu.matmul %1, %2, %cst {dimension_numbers = #tpu.dot_dimension_numbers<[1], [0], [0], [1], [0, 0, 1, 1], [], []>} : vector<256x128xbf16>, vector<128x128xbf16>, vector<256x128xf32> -> vector<256x128xf32>
    %4 = arith.truncf %3 : vector<256x128xf32> to vector<256x128xbf16>
    %c0_4 = arith.constant 0 : index
    %c0_5 = arith.constant 0 : index
    %c0_6 = arith.constant 0 : index
    %5 = vector.load %arg4[%c0_4, %c0_5, %c0_6] : memref<1x256x128xbf16, #tpu.memory_space<vmem>>, vector<1x256x128xbf16>
    %6 = vector.shape_cast %5 : vector<1x256x128xbf16> to vector<256x128xbf16>
    %7 = vector.shape_cast %4 : vector<256x128xbf16> to vector<1x256x128xbf16>
    tpu.vector_store %arg4[%c0_4, %c0_5, %c0_6], %7 {strides = array<i32>} : memref<1x256x128xbf16, #tpu.memory_space<vmem>>, vector<1x256x128xbf16>,
    %cst_7 = arith.constant dense<0.000000e+00> : vector<128xf32>
    %8 = vector.multi_reduction <add>, %3, %cst_7 [0] : vector<256x128xf32> to vector<128xf32>
    %9 = vector.shape_cast %8 : vector<128xf32> to vector<1x128xf32>
    %10 = arith.mulf %3, %3 : vector<256x128xf32>
    %cst_8 = arith.constant dense<0.000000e+00> : vector<128xf32>
    %11 = vector.multi_reduction <add>, %10, %cst_8 [0] : vector<256x128xf32> to vector<128xf32>
    %12 = vector.shape_cast %11 : vector<128xf32> to vector<1x128xf32>
    %cst_9 = arith.constant 0.000000e+00 : f32
    %13 = vector.broadcast %cst_9 : f32 to vector<6x128xf32>
    %14 = tpu.concatenate %9, %12, %13 in 0 : vector<1x128xf32>, vector<1x128xf32>, vector<6x128xf32> -> vector<8x128xf32>
    %c0_10 = arith.constant 0 : index
    %c0_11 = arith.constant 0 : index
    %c0_12 = arith.constant 0 : index
    %c0_13 = arith.constant 0 : index
    %15 = vector.load %arg5[%c0_10, %c0_11, %c0_12, %c0_13] : memref<1x1x8x128xf32, #tpu.memory_space<vmem>>, vector<1x1x8x128xf32>
    %16 = vector.shape_cast %15 : vector<1x1x8x128xf32> to vector<8x128xf32>
    %17 = vector.shape_cast %14 : vector<8x128xf32> to vector<1x1x8x128xf32>
    tpu.vector_store %arg5[%c0_10, %c0_11, %c0_12, %c0_13], %17 {strides = array<i32>} : memref<1x1x8x128xf32, #tpu.memory_space<vmem>>, vector<1x1x8x128xf32>,
    return
  }
  func.func @transform_0(%arg0: i32, %arg1: i32) -> (i32, i32, i32) {
    %c0_i32 = arith.constant 0 : i32
    %c0_i32_0 = arith.constant 0 : i32
    return %arg0, %arg1, %c0_i32 : i32, i32, i32
  }
  func.func @transform_1(%arg0: i32, %arg1: i32) -> (i32, i32) {
    %c0_i32 = arith.constant 0 : i32
    %c0_i32_0 = arith.constant 0 : i32
    %c0_i32_1 = arith.constant 0 : i32
    return %c0_i32, %c0_i32_0 : i32, i32
  }
  func.func @transform_2(%arg0: i32, %arg1: i32) -> (i32, i32, i32) {
    %c0_i32 = arith.constant 0 : i32
    %c0_i32_0 = arith.constant 0 : i32
    return %arg0, %arg1, %c0_i32 : i32, i32, i32
  }
  func.func @transform_3(%arg0: i32, %arg1: i32) -> (i32, i32, i32, i32) {
    %c0_i32 = arith.constant 0 : i32
    %c0_i32_0 = arith.constant 0 : i32
    %c0_i32_1 = arith.constant 0 : i32
    return %arg0, %arg1, %c0_i32, %c0_i32_0 : i32, i32, i32, i32
  }
}

module attributes {stable_mosaic.version = 11 : i64} {
  func.func @_bn_act_kernel(%arg0: i32, %arg1: i32, %arg2: memref<1x16x16x128xbf16, #tpu.memory_space<vmem>>, %arg3: memref<1x128xf32, #tpu.memory_space<vmem>>, %arg4: memref<1x128xf32, #tpu.memory_space<vmem>>, %arg5: memref<1x16x16x128xbf16, #tpu.memory_space<vmem>>) attributes {dimension_semantics = [#tpu.dimension_semantics<parallel>, #tpu.dimension_semantics<parallel>], iteration_bounds = array<i64: 2, 1>, scalar_prefetch = 0 : i64, scratch_operands = 0 : i64, tpu.core_type = #tpu.core_type<tc>, window_params = [{transform_indices = @transform_0, window_bounds = array<i64: 1, 16, 16, 128>}, {pipeline_mode = #tpu.pipeline_mode<synchronous>, transform_indices = @transform_1, window_bounds = array<i64: 1, 128>}, {pipeline_mode = #tpu.pipeline_mode<synchronous>, transform_indices = @transform_2, window_bounds = array<i64: 1, 128>}, {transform_indices = @transform_3, window_bounds = array<i64: 1, 16, 16, 128>}]} {
    %c0 = arith.constant 0 : index
    %c0_0 = arith.constant 0 : index
    %c0_1 = arith.constant 0 : index
    %c0_2 = arith.constant 0 : index
    %0 = vector.load %arg2[%c0, %c0_0, %c0_1, %c0_2] : memref<1x16x16x128xbf16, #tpu.memory_space<vmem>>, vector<1x16x16x128xbf16>
    %1 = vector.shape_cast %0 : vector<1x16x16x128xbf16> to vector<16x16x128xbf16>
    %2 = arith.extf %1 : vector<16x16x128xbf16> to vector<16x16x128xf32>
    %c0_3 = arith.constant 0 : index
    %c0_4 = arith.constant 0 : index
    %3 = vector.load %arg3[%c0_3, %c0_4] : memref<1x128xf32, #tpu.memory_space<vmem>>, vector<1x128xf32>
    %4 = vector.shape_cast %3 : vector<1x128xf32> to vector<128xf32>
    %5 = vector.shape_cast %4 : vector<128xf32> to vector<1x1x128xf32>
    %6 = vector.broadcast %5 : vector<1x1x128xf32> to vector<16x16x128xf32>
    %7 = arith.mulf %2, %6 : vector<16x16x128xf32>
    %c0_5 = arith.constant 0 : index
    %c0_6 = arith.constant 0 : index
    %8 = vector.load %arg4[%c0_5, %c0_6] : memref<1x128xf32, #tpu.memory_space<vmem>>, vector<1x128xf32>
    %9 = vector.shape_cast %8 : vector<1x128xf32> to vector<128xf32>
    %10 = vector.shape_cast %9 : vector<128xf32> to vector<1x1x128xf32>
    %11 = vector.broadcast %10 : vector<1x1x128xf32> to vector<16x16x128xf32>
    %12 = arith.addf %7, %11 : vector<16x16x128xf32>
    %cst = arith.constant 0.000000e+00 : f32
    %13 = vector.broadcast %cst : f32 to vector<16x16x128xf32>
    %14 = arith.maximumf %12, %13 : vector<16x16x128xf32>
    %15 = arith.truncf %14 : vector<16x16x128xf32> to vector<16x16x128xbf16>
    %c0_7 = arith.constant 0 : index
    %c0_8 = arith.constant 0 : index
    %c0_9 = arith.constant 0 : index
    %c0_10 = arith.constant 0 : index
    %16 = vector.load %arg5[%c0_7, %c0_8, %c0_9, %c0_10] : memref<1x16x16x128xbf16, #tpu.memory_space<vmem>>, vector<1x16x16x128xbf16>
    %17 = vector.shape_cast %16 : vector<1x16x16x128xbf16> to vector<16x16x128xbf16>
    %18 = vector.shape_cast %15 : vector<16x16x128xbf16> to vector<1x16x16x128xbf16>
    tpu.vector_store %arg5[%c0_7, %c0_8, %c0_9, %c0_10], %18 {strides = array<i32>} : memref<1x16x16x128xbf16, #tpu.memory_space<vmem>>, vector<1x16x16x128xbf16>,
    return
  }
  func.func @transform_0(%arg0: i32, %arg1: i32) -> (i32, i32, i32, i32) {
    %c0_i32 = arith.constant 0 : i32
    %c0_i32_0 = arith.constant 0 : i32
    %c0_i32_1 = arith.constant 0 : i32
    return %arg0, %arg1, %c0_i32, %c0_i32_0 : i32, i32, i32, i32
  }
  func.func @transform_1(%arg0: i32, %arg1: i32) -> (i32, i32) {
    %c0_i32 = arith.constant 0 : i32
    %c0_i32_0 = arith.constant 0 : i32
    %c0_i32_1 = arith.constant 0 : i32
    return %c0_i32, %c0_i32_0 : i32, i32
  }
  func.func @transform_2(%arg0: i32, %arg1: i32) -> (i32, i32) {
    %c0_i32 = arith.constant 0 : i32
    %c0_i32_0 = arith.constant 0 : i32
    %c0_i32_1 = arith.constant 0 : i32
    return %c0_i32, %c0_i32_0 : i32, i32
  }
  func.func @transform_3(%arg0: i32, %arg1: i32) -> (i32, i32, i32, i32) {
    %c0_i32 = arith.constant 0 : i32
    %c0_i32_0 = arith.constant 0 : i32
    %c0_i32_1 = arith.constant 0 : i32
    return %arg0, %arg1, %c0_i32, %c0_i32_0 : i32, i32, i32, i32
  }
}

</mosaic_0001>

<bundles_post_ra>
// kernel: cbr2d_nhwc.3
= control target key start
LH: loop header
LB: loop body
LE: loop exit
PB: predicated region body
PF: predicated region fallthrough
CT: control target
= control target key end

     0   :  { %8 = vsyncpa [#allocation3], 0  ;;  %s1281_s0 = inlined_call_operand.vmem [shape: bf16[2,16,16,128], index: 0, kind: input, shape index: {}]   ;;  %s1282_s1 = inlined_call_operand.vmem [shape: f32[1,128], index: 1, kind: input, shape index: {}]   ;;  %s1283_s2 = inlined_call_operand.vmem [shape: f32[1,128], index: 2, kind: input, shape index: {}]   ;;  %s1284_s3 = inlined_call_operand.hbm [shape: bf16[2,16,16,128], index: 3, kind: output, shape index: {}]  }
   0x1   :  { %10 = vsyncpa [#allocation3 + $0x1], 0  ;;  %s1051_s12 = smov 0   ;;  %s1053_s13 = smov 0  }
   0x2   :  { %s1055_s14 = smov 0   ;;  %s1057_s15 = smov 0  }
   0x3   :  { %s1059_s16 = smov 0   ;;  %s1061_s17 = smov 0  }
   0x4 LB: > { %s636_s18 = sadd.s32 4294967295, %s1026_s17   ;;  %s637_s19 = sadd.s32 4294967294, %s1026_s17   ;;  %s1026_s17 = sphi %s1061_s17, %s16_s17   ;;  %s1022_s16 = sphi %s1059_s16, %s1291_s16   ;;  %s1018_s15 = sphi %s1057_s15, %s1290_s15   ;;  %s1014_s14 = sphi %s1055_s14, %s1289_s14   ;;  %s1010_s13 = sphi %s1053_s13, %s1288_s13   ;;  %s1006_s12 = sphi %s1051_s12, %s1287_s12  }
   0x5   : > { %s28_s20 = sadd.s32 1, %s1022_s16  ;;  %s107_s21 = sadd.s32 1, %s1014_s14 }
   0x6   : > { %p30_p0 = scmp.ge.s32.totalorder %s28_s20, 2  ;;  %p117_p1 = scmp.ne.s32.totalorder %s1014_s14, %s1010_s13 }
   0x7   : > { %p118_p2 = scmp.eq.s32.totalorder %s636_s18, 1  ;;  %p123_p3 = scmp.ne.s32.totalorder %s1010_s13, %s1006_s12 }
   0x8   : > { %s1293_s20 = smov (%p30_p0, %s28_s20), 0  ;;  %p124_p5 = scmp.eq.s32.totalorder %s637_s19, 1 }
   0x9   : > { %p1091_p4 = por %p118_p2, %p117_p1  ;;  %s102_s23 = ssub.s32 %s1022_s16, %s1293_s20 }
   0xa   : > { %p640_p6 = scmp.ge.s32.totalorder %s1026_s17, 1  ;;  %p105_p7 = scmp.eq.s32.totalorder %s102_s23, 0 }
   0xb   : > { %p1098_p8 = por %p124_p5, %p123_p3  ;;  %p162_p9 = scmp.lt.s32.totalorder %s1026_s17, 3 }
   0xc   : > { %s1104_s25 = scalar_select %p105_p7, %s1014_s14, %s107_s21  }
   0xd   : > { %p163_p10 = pnand %p640_p6, %p162_p9 }
   0xe   : > { %p192_p11 = scmp.lt.s32.totalorder (!%p163_p10), %s1018_s15, 1  ;;  %v1116_v0 = vld [vmem:[%s1282_s1] ss:$0 sm:$0xff] (!%p163_p10)  ;;  %s188_s6 = sand.u32 (!%p163_p10), 1, %s1010_s13  }
   0xf   : > { %166 = sbr.rel (%p163_p10) target bundleno = 83 (0x53), region = 32  ;;  %v1126_v9 = vld [vmem:[%s1283_s2] ss:$0 sm:$0xff] (!%p163_p10)  ;;  %s641_s9 = sshll.u32 (!%p163_p10), %s188_s6, 7 }
  0x10   : > { %s1150_s10 = scalar_lea.vmem (!%p163_p10), [#allocation2], %s641_s9  ;;  %s716_s11 = sshll.u32 (!%p163_p10), %s1018_s15, 11 }
  0x11   : > { %s554_s18 = sshll.u32 (!%p163_p10), %s1150_s10, 4  ;;  %s1228_s23 = scalar_lea.hbm (!%p163_p10), %s1284_s3, %s716_s11  ;;  %s1230_s18 = int_to_ptr.vmem [resolvable:$true] %s554_s18 }
  0x16   : > { %s193_s26 = scalar_select %p192_p11, %s1018_s15, 1 }
  0x17   : > { %s1235_s15 = scalar_lea.sflag [#allocation3], %s188_s6 }
  0x18   : > { %s683_s27 = sshll.u32 %s193_s26, 7  ;;  %s948_s26 = scalar_lea.vmem %s1230_s18, 2048 }
  0x19   : > { %s1111_s30 = scalar_lea.vmem %s1281_s0, %s683_s27  ;;  %p949_p12 = scmp.ne.s32.totalorder %s1230_s18, %s948_s26 }
  0x1a   : > { %v718_v1 = vld [vmem:[%s1111_s30] sm:$0xff]   ;;  %v861_v2 = vld [vmem:[%s1111_s30 + $0x8] sm:$0xff]   ;;  %v862_v3 = vld [vmem:[%s1111_s30 + $0x10] sm:$0xff]   ;;  %s1028_s27 = smov [#allocation2]  }
  0x1b   : > { %v719_v4 = vunpack.c.l.bf16 %v718_v1  ;;  %v720_v5 = vunpack.c.h.bf16 %v718_v1  ;;  %v723_v6 = vunpack.c.l.bf16 %v861_v2  ;;  %v724_v7 = vunpack.c.h.bf16 %v861_v2  ;;  %v863_v8 = vld [vmem:[%s1111_s30 + $0x18] sm:$0xff]   ;;  %v864_v30 = vld [vmem:[%s1111_s30 + $0x20] sm:$0xff]   ;;  %v865_v35 = vld [vmem:[%s1111_s30 + $0x28] sm:$0xff]   ;;  %p950_p13 = pnand %p949_p12, %p1091_p4  ;;  %s952_s28 = sshll.u32 %s1028_s27, 4  ;;  %s953_s28 = int_to_ptr.vmem [resolvable:$false] %s952_s28 }
  0x1c   : > { %v727_v10 = vunpack.c.l.bf16 %v862_v3  ;;  %v728_v11 = vunpack.c.h.bf16 %v862_v3  ;;  %v731_v12 = vunpack.c.l.bf16 %v863_v8  ;;  %v732_v13 = vunpack.c.h.bf16 %v863_v8  ;;  %v866_v40 = vld [vmem:[%s1111_s30 + $0x30] sm:$0xff]   ;;  %v867_v45 = vld [vmem:[%s1111_s30 + $0x38] sm:$0xff]   ;;  %v868_v3 = vld [vmem:[%s1111_s30 + $0x40] sm:$0xff]   ;;  %s954_s29 = scalar_lea.vmem %s953_s28, 4096  ;;  %p955_p1 = scmp.lt.s32.totalorder %s1230_s18, %s953_s28 }
  0x1d   : > { %v274_v14 = vmul.f32 %v719_v4, %v1116_v0  ;;  %v275_v15 = vmul.f32 %v720_v5, %v1116_v0  ;;  %v276_v16 = vmul.f32 %v723_v6, %v1116_v0  ;;  %v277_v17 = vmul.f32 %v724_v7, %v1116_v0  ;;  %p951_p0 = pneg %p950_p13  ;;  %p956_p2 = scmp.lt.s32.totalorder %s954_s29, %s948_s26 }
  0x1e   : > { %v278_v18 = vmul.f32 %v727_v10, %v1116_v0  ;;  %v279_v19 = vmul.f32 %v728_v11, %v1116_v0  ;;  %v280_v20 = vmul.f32 %v731_v12, %v1116_v0  ;;  %v281_v21 = vmul.f32 %v732_v13, %v1116_v0  ;;  %v869_v13 = vld [vmem:[%s1111_s30 + $0x48] sm:$0xff]  }
  0x1f   : > { %v313_v22 = vadd.f32 %v1126_v9, %v274_v14  ;;  %v314_v23 = vadd.f32 %v1126_v9, %v275_v15  ;;  %v315_v24 = vadd.f32 %v1126_v9, %v276_v16  ;;  %v316_v25 = vadd.f32 %v1126_v9, %v277_v17  ;;  %p957_p3 = por %p956_p2, %p955_p1 }
  0x20   : > { %v317_v26 = vadd.f32 %v1126_v9, %v278_v18  ;;  %v318_v27 = vadd.f32 %v1126_v9, %v279_v19  ;;  %v319_v28 = vadd.f32 %v1126_v9, %v280_v20  ;;  %v320_v29 = vadd.f32 %v1126_v9, %v281_v21  ;;  %v870_v18 = vld [vmem:[%s1111_s30 + $0x50] sm:$0xff]  }
  0x21   : > { %v345_v31 = vmax.f32 %v313_v22, 0.0  ;;  %v346_v32 = vmax.f32 %v314_v23, 0.0  ;;  %v347_v33 = vmax.f32 %v315_v24, 0.0  ;;  %v348_v34 = vmax.f32 %v316_v25, 0.0  ;;  %v871_v23 = vld [vmem:[%s1111_s30 + $0x58] sm:$0xff]   ;;  %p958_p5 = pnand %p957_p3, %p951_p0 }
  0x22   : > { %v349_v36 = vmax.f32 %v317_v26, 0.0  ;;  %v350_v37 = vmax.f32 %v318_v27, 0.0  ;;  %v351_v38 = vmax.f32 %v319_v28, 0.0  ;;  %v352_v39 = vmax.f32 %v320_v29, 0.0 }
  0x23   : > { %v784_v41 = vpack.c.bf16 %v346_v32, %v345_v31  ;;  %v789_v42 = vpack.c.bf16 %v348_v34, %v347_v33  ;;  %v735_v43 = vunpack.c.l.bf16 %v864_v30  ;;  %v736_v44 = vunpack.c.h.bf16 %v864_v30 }
  0x24   : > { %v794_v46 = vpack.c.bf16 %v350_v37, %v349_v36  ;;  %v799_v47 = vpack.c.bf16 %v352_v39, %v351_v38  ;;  %v739_v48 = vunpack.c.l.bf16 %v865_v35  ;;  %v740_v49 = vunpack.c.h.bf16 %v865_v35 }
  0x25   : > { %785 = vst [vmem:[%s1150_s10] sm:$0xff] %v784_v41   ;;  %876 = vst [vmem:[%s1150_s10 + $0x8] sm:$0xff] %v789_v42   ;;  %v282_v50 = vmul.f32 %v735_v43, %v1116_v0  ;;  %v283_v51 = vmul.f32 %v736_v44, %v1116_v0  ;;  %v743_v52 = vunpack.c.l.bf16 %v866_v40  ;;  %v744_v53 = vunpack.c.h.bf16 %v866_v40  ;;  %v872_v40 = vld [vmem:[%s1111_s30 + $0x60] sm:$0xff]  }
  0x26   : > { %877 = vst [vmem:[%s1150_s10 + $0x10] sm:$0xff] %v794_v46   ;;  %878 = vst [vmem:[%s1150_s10 + $0x18] sm:$0xff] %v799_v47   ;;  %v284_v54 = vmul.f32 %v739_v48, %v1116_v0  ;;  %v285_v55 = vmul.f32 %v740_v49, %v1116_v0  ;;  %v747_v56 = vunpack.c.l.bf16 %v867_v45  ;;  %v748_v57 = vunpack.c.h.bf16 %v867_v45 }
  0x27   : > { %v321_v58 = vadd.f32 %v1126_v9, %v282_v50  ;;  %v322_v59 = vadd.f32 %v1126_v9, %v283_v51  ;;  %v286_v60 = vmul.f32 %v743_v52, %v1116_v0  ;;  %v287_v61 = vmul.f32 %v744_v53, %v1116_v0  ;;  %v873_v53 = vld [vmem:[%s1111_s30 + $0x68] sm:$0xff]  }
  0x28   : > { %v323_v62 = vadd.f32 %v1126_v9, %v284_v54  ;;  %v324_v63 = vadd.f32 %v1126_v9, %v285_v55  ;;  %v288_v1 = vmul.f32 %v747_v56, %v1116_v0  ;;  %v289_v2 = vmul.f32 %v748_v57, %v1116_v0 }
  0x29   : > { %v353_v4 = vmax.f32 %v321_v58, 0.0  ;;  %v354_v5 = vmax.f32 %v322_v59, 0.0  ;;  %v325_v6 = vadd.f32 %v1126_v9, %v286_v60  ;;  %v326_v7 = vadd.f32 %v1126_v9, %v287_v61  ;;  %v874_v58 = vld [vmem:[%s1111_s30 + $0x70] sm:$0xff]  }
  0x2a   : > { %v355_v8 = vmax.f32 %v323_v62, 0.0  ;;  %v356_v10 = vmax.f32 %v324_v63, 0.0  ;;  %v327_v11 = vadd.f32 %v1126_v9, %v288_v1  ;;  %v328_v12 = vadd.f32 %v1126_v9, %v289_v2  ;;  %v875_v63 = vld [vmem:[%s1111_s30 + $0x78] sm:$0xff]  }
  0x2b   : > { %v804_v14 = vpack.c.bf16 %v354_v5, %v353_v4  ;;  %v357_v15 = vmax.f32 %v325_v6, 0.0  ;;  %v358_v16 = vmax.f32 %v326_v7, 0.0  ;;  %v751_v17 = vunpack.c.l.bf16 %v868_v3 }
  0x2c   : > { %v809_v19 = vpack.c.bf16 %v356_v10, %v355_v8  ;;  %v359_v20 = vmax.f32 %v327_v11, 0.0  ;;  %v360_v21 = vmax.f32 %v328_v12, 0.0  ;;  %v752_v22 = vunpack.c.h.bf16 %v868_v3 }
  0x2d   : > { %879 = vst [vmem:[%s1150_s10 + $0x20] sm:$0xff] %v804_v14   ;;  %v814_v24 = vpack.c.bf16 %v358_v16, %v357_v15  ;;  %v290_v25 = vmul.f32 %v751_v17, %v1116_v0  ;;  %v755_v26 = vunpack.c.l.bf16 %v869_v13  ;;  %v756_v27 = vunpack.c.h.bf16 %v869_v13 }
  0x2e   : > { %880 = vst [vmem:[%s1150_s10 + $0x28] sm:$0xff] %v809_v19   ;;  %v819_v28 = vpack.c.bf16 %v360_v21, %v359_v20  ;;  %v291_v29 = vmul.f32 %v752_v22, %v1116_v0  ;;  %v759_v30 = vunpack.c.l.bf16 %v870_v18  ;;  %v760_v31 = vunpack.c.h.bf16 %v870_v18 }
  0x2f   : > { %881 = vst [vmem:[%s1150_s10 + $0x30] sm:$0xff] %v814_v24   ;;  %v329_v32 = vadd.f32 %v1126_v9, %v290_v25  ;;  %v292_v33 = vmul.f32 %v755_v26, %v1116_v0  ;;  %v293_v34 = vmul.f32 %v756_v27, %v1116_v0  ;;  %v763_v35 = vunpack.c.l.bf16 %v871_v23 }
  0x30   : > { %882 = vst [vmem:[%s1150_s10 + $0x38] sm:$0xff] %v819_v28   ;;  %v330_v36 = vadd.f32 %v1126_v9, %v291_v29  ;;  %v294_v37 = vmul.f32 %v759_v30, %v1116_v0  ;;  %v295_v38 = vmul.f32 %v760_v31, %v1116_v0  ;;  %v764_v39 = vunpack.c.h.bf16 %v871_v23 }
  0x31   : > { %v361_v41 = vmax.f32 %v329_v32, 0.0  ;;  %v331_v42 = vadd.f32 %v1126_v9, %v292_v33  ;;  %v332_v43 = vadd.f32 %v1126_v9, %v293_v34  ;;  %v296_v44 = vmul.f32 %v763_v35, %v1116_v0 }
  0x32   : > { %v362_v45 = vmax.f32 %v330_v36, 0.0  ;;  %v333_v46 = vadd.f32 %v1126_v9, %v294_v37  ;;  %v334_v47 = vadd.f32 %v1126_v9, %v295_v38  ;;  %v297_v48 = vmul.f32 %v764_v39, %v1116_v0 }
  0x33   : > { %v363_v49 = vmax.f32 %v331_v42, 0.0  ;;  %v364_v50 = vmax.f32 %v332_v43, 0.0  ;;  %v335_v51 = vadd.f32 %v1126_v9, %v296_v44  ;;  %v767_v52 = vunpack.c.l.bf16 %v872_v40 }
  0x34   : > { %v824_v54 = vpack.c.bf16 %v362_v45, %v361_v41  ;;  %v365_v55 = vmax.f32 %v333_v46, 0.0  ;;  %v366_v56 = vmax.f32 %v334_v47, 0.0  ;;  %v336_v57 = vadd.f32 %v1126_v9, %v297_v48 }
  0x35   : > { %v829_v59 = vpack.c.bf16 %v364_v50, %v363_v49  ;;  %v367_v60 = vmax.f32 %v335_v51, 0.0  ;;  %v768_v61 = vunpack.c.h.bf16 %v872_v40  ;;  %v298_v62 = vmul.f32 %v767_v52, %v1116_v0 }
  0x36   : > { %883 = vst [vmem:[%s1150_s10 + $0x40] sm:$0xff] %v824_v54   ;;  %v834_v1 = vpack.c.bf16 %v366_v56, %v365_v55  ;;  %v368_v2 = vmax.f32 %v336_v57, 0.0  ;;  %v771_v3 = vunpack.c.l.bf16 %v873_v53  ;;  %v772_v4 = vunpack.c.h.bf16 %v873_v53 }
  0x37   : > { %884 = vst [vmem:[%s1150_s10 + $0x48] sm:$0xff] %v829_v59   ;;  %v299_v5 = vmul.f32 %v768_v61, %v1116_v0  ;;  %v337_v6 = vadd.f32 %v1126_v9, %v298_v62  ;;  %v775_v7 = vunpack.c.l.bf16 %v874_v58  ;;  %v776_v8 = vunpack.c.h.bf16 %v874_v58 }
  0x38   : > { %885 = vst [vmem:[%s1150_s10 + $0x50] sm:$0xff] %v834_v1   ;;  %v839_v10 = vpack.c.bf16 %v368_v2, %v367_v60  ;;  %v300_v11 = vmul.f32 %v771_v3, %v1116_v0  ;;  %v301_v12 = vmul.f32 %v772_v4, %v1116_v0  ;;  %v779_v13 = vunpack.c.l.bf16 %v875_v63 }
  0x39   : > { %v338_v14 = vadd.f32 %v1126_v9, %v299_v5  ;;  %v369_v15 = vmax.f32 %v337_v6, 0.0  ;;  %v302_v16 = vmul.f32 %v775_v7, %v1116_v0  ;;  %v303_v17 = vmul.f32 %v776_v8, %v1116_v0 }
  0x3a   : > { %886 = vst [vmem:[%s1150_s10 + $0x58] sm:$0xff] %v839_v10   ;;  %v339_v18 = vadd.f32 %v1126_v9, %v300_v11  ;;  %v340_v19 = vadd.f32 %v1126_v9, %v301_v12  ;;  %v780_v20 = vunpack.c.h.bf16 %v875_v63  ;;  %v304_v21 = vmul.f32 %v779_v13, %v1116_v0 }
  0x3b   : > { %v370_v22 = vmax.f32 %v338_v14, 0.0  ;;  %v341_v23 = vadd.f32 %v1126_v9, %v302_v16  ;;  %v342_v24 = vadd.f32 %v1126_v9, %v303_v17 }
  0x3c   : > { %v371_v25 = vmax.f32 %v339_v18, 0.0  ;;  %v372_v26 = vmax.f32 %v340_v19, 0.0  ;;  %v305_v27 = vmul.f32 %v780_v20, %v1116_v0  ;;  %v343_v28 = vadd.f32 %v1126_v9, %v304_v21 }
  0x3d   : > { %v844_v29 = vpack.c.bf16 %v370_v22, %v369_v15  ;;  %v373_v30 = vmax.f32 %v341_v23, 0.0  ;;  %v374_v31 = vmax.f32 %v342_v24, 0.0 }
  0x3e   : > { %v849_v32 = vpack.c.bf16 %v372_v26, %v371_v25  ;;  %v344_v33 = vadd.f32 %v1126_v9, %v305_v27  ;;  %v375_v34 = vmax.f32 %v343_v28, 0.0 }
  0x3f   : > { %887 = vst [vmem:[%s1150_s10 + $0x60] sm:$0xff] %v844_v29   ;;  %v854_v35 = vpack.c.bf16 %v374_v31, %v373_v30 }
  0x40   : > { %888 = vst [vmem:[%s1150_s10 + $0x68] sm:$0xff] %v849_v32   ;;  %v376_v36 = vmax.f32 %v344_v33, 0.0 }
  0x41   : > { %889 = vst [vmem:[%s1150_s10 + $0x70] sm:$0xff] %v854_v35  }
  0x42   : > { %v859_v0 = vpack.c.bf16 %v376_v36, %v375_v34 }
  0x44   : > { %890 = vst [vmem:[%s1150_s10 + $0x78] sm:$0xff] %v859_v0  }
  0x45   : > { %961 = shalt.err (!%p958_p5)
}
  0x46   : > { %s962_s30 = scalar_lea.hbm %s1228_s23, 2048  ;;  %s966_s6 = scalar_lea.hbm %s1284_s3, 4096 }
  0x47   : > { %p963_p6 = scmp.ne.s32.totalorder %s1228_s23, %s962_s30  ;;  %p967_p10 = scmp.lt.u32.totalorder %s1228_s23, %s1284_s3 }
  0x48   : > { %p968_p11 = scmp.lt.u32.totalorder %s966_s6, %s962_s30  ;;  %p970_p13 = scmp.lt.u32.totalorder %s962_s30, %s1228_s23 }
  0x49   : > { %p964_p7 = pnand %p963_p6, %p1091_p4 }
  0x4a   : > { %p969_p12 = por %p968_p11, %p967_p10 }
  0x4b   : > { %p965_p9 = pneg %p964_p7 }
  0x4c   : > { %p971_p0 = por %p970_p13, %p969_p12 }
  0x4e   : > { %p972_p1 = pnand %p971_p0, %p965_p9 }
  0x50   : > { %975 = shalt.err (!%p972_p1)
}
  0x51   : > { %s1029_s9 = smov 64   ;;  %s1030_s10 = smov 4  }
  0x52   : > { %891 = dma.vmem_to_hbm [thread:$0]  (%p1091_p4), %s1230_s18, 2048, %s1228_s23, %s1235_s15, %s1029_s9, %s1029_s9, %s1030_s10  }
  0x53 PF: > { %p897_p2 = scmp.ge.s32.totalorder %s1026_s17, 2  ;;  %s569_s11 = sand.u32 1, %s1006_s12  }
  0x54   : > { %s570_s19 = scalar_lea.sflag [#allocation3], %s569_s11 }
  0x55   : > { %p894_p3 = pnand %p897_p2, %p1098_p8 }
  0x57   : > { %1001 = dma.done.wait (!%p894_p3), %s570_s19, 2048  }
  0x58   : > { %1003 = vsyncadd (!%p894_p3), %s570_s19, 4294965248  ;;  %s16_s17 = sadd.s32 1, %s1026_s17   ;;  %s1287_s12 = smov %s1010_s13 }
  0x59   : > { %p13_p5 = scmp.ge.s32.totalorder %s16_s17, 4   ;;  %s1288_s13 = smov %s1014_s14 }
  0x5a   : > { %s1289_s14 = smov %s1104_s25  ;;  %s1290_s15 = smov %s1022_s16 }
  0x5b   : > { %s1291_s16 = smov %s1293_s20  ;;  %15 = sbr.rel (!%p13_p5) target bundleno = 4 (0x4), region = 67 }
  0x62   :  { %575 = vsyncpa [#allocation3], 1 }
  0x63   :  { %577 = vsyncpa [#allocation3 + $0x1], 1 }

// kernel: cbr2d_nhwc.2
= control target key start
LH: loop header
LB: loop body
LE: loop exit
PB: predicated region body
PF: predicated region fallthrough
CT: control target
= control target key end

     0   :  { %s1359_s12 = smov 0   ;;  %s1361_s13 = smov 0   ;;  %s1547_s0 = inlined_call_operand.vmem [shape: bf16[2,256,128], index: 0, kind: input, shape index: {}]   ;;  %s1548_s1 = inlined_call_operand.vmem [shape: bf16[128,128], index: 1, kind: input, shape index: {}]   ;;  %s1549_s2 = inlined_call_operand.vmem [shape: bf16[2,256,128], index: 2, kind: output, shape index: {0}]   ;;  %s1550_s3 = inlined_call_operand.vmem [shape: f32[2,1,8,128], index: 3, kind: output, shape index: {1}]  }
   0x1   :  { %s1363_s14 = smov 0  }
   0x2 LB: > { %s26_s15 = sadd.s32 1, %s1333_s13  ;;  %p986_p0 = scmp.ge.s32.totalorder %s1337_s14, 1  ;;  %s1337_s14 = sphi %s1363_s14, %s14_s14   ;;  %s1333_s13 = sphi %s1361_s13, %s1552_s13   ;;  %s1329_s12 = sphi %s1359_s12, %s1551_s12  }
   0x3   : > { %p28_p1 = scmp.ge.s32.totalorder %s26_s15, 2  ;;  %p163_p2 = scmp.lt.s32.totalorder %s1337_s14, 3 }
   0x5   : > { %s1554_s15 = smov (%p28_p1, %s26_s15), 0  ;;  %p164_p3 = pnand %p986_p0, %p163_p2 }
   0x6   : > { %v1291_v0 = vld [vmem:[%s1548_s1] sm:$0xff] (!%p164_p3)   ;;  %p203_p4 = scmp.lt.s32.totalorder (!%p164_p3), %s1329_s12, 1  ;;  %v1292_v1 = vld [vmem:[%s1548_s1 + $0x8] sm:$0xff] (!%p164_p3)   ;;  %v1293_v2 = vld [vmem:[%s1548_s1 + $0x10] sm:$0xff] (!%p164_p3)   ;;  %vm849_vm0 = vcmask (!%p164_p3), 1040384   ;;  %vm851_vm1 = vcmask (!%p164_p3), 1041408  }
   0x7   : > { %167 = sbr.rel (%p164_p3) target bundleno = 333 (0x14d), region = 28  ;;  %1203 = vmatprep.subr.bf16.mxu0 (!%p164_p3), %v1291_v0  ;;  %1251 = vmatprep.subr.bf16.mxu1 (!%p164_p3), %v1291_v0  ;;  %v1294_v3 = vld [vmem:[%s1548_s1 + $0x18] sm:$0xff] (!%p164_p3)   ;;  %v1295_v5 = vld [vmem:[%s1548_s1 + $0x20] sm:$0xff] (!%p164_p3)   ;;  %v1296_v6 = vld [vmem:[%s1548_s1 + $0x28] sm:$0xff] (!%p164_p3)  }
   0x8   : > { %1204 = vmatpush3.bf16.msra.mxu0 (!%p164_p3), %v1291_v0  ;;  %1259 = vmatpush3.bf16.msra.mxu1 (!%p164_p3), %v1291_v0  ;;  %v1297_v8 = vld [vmem:[%s1548_s1 + $0x30] sm:$0xff] (!%p164_p3)   ;;  %v1298_v9 = vld [vmem:[%s1548_s1 + $0x38] sm:$0xff] (!%p164_p3)  }
   0x9   : > { %1205 = vmatprep.subr.bf16.mxu0 (!%p164_p3), %v1292_v1  ;;  %1252 = vmatprep.subr.bf16.mxu1 (!%p164_p3), %v1292_v1 }
   0xc   : > { %1206 = vmatpush3.bf16.msra.mxu0 (!%p164_p3), %v1292_v1  ;;  %1260 = vmatpush3.bf16.msra.mxu1 (!%p164_p3), %v1292_v1 }
   0xd   : > { %1207 = vmatprep.subr.bf16.mxu0 (!%p164_p3), %v1293_v2  ;;  %1253 = vmatprep.subr.bf16.mxu1 (!%p164_p3), %v1293_v2 }
   0xe   : > { %s1556_s12 = smov (!%p203_p4, %s1329_s12), 1 }
   0xf   : > { %s1050_s22 = sshll.u32 %s1556_s12, 7  ;;  %s991_s16 = sshll.u32 %s1556_s12, 3 }
  0x10   : > { %s1394_s25 = scalar_lea.vmem %s1547_s0, %s1050_s22  ;;  %1208 = vmatpush3.bf16.msra.mxu0 %v1293_v2  ;;  %1261 = vmatpush3.bf16.msra.mxu1 %v1293_v2  ;;  %s1436_s11 = scalar_lea.vmem %s1549_s2, %s1050_s22 }
  0x11   : > { %v1299_v4 = vld [vmem:[%s1394_s25] sm:$0xff]   ;;  %1209 = vmatprep.subr.bf16.mxu0 %v1294_v3  ;;  %1254 = vmatprep.subr.bf16.mxu1 %v1294_v3  ;;  %v1300_v10 = vld [vmem:[%s1394_s25 + $0x8] sm:$0xff]   ;;  %v1301_v12 = vld [vmem:[%s1394_s25 + $0x10] sm:$0xff]   ;;  %s228_s19 = scalar_lea.vmem %s1550_s3, %s991_s16 }
  0x12   : > { %1219 = vmatprep.mubr.bf16.mxu0 %v1299_v4  ;;  %v1307_v7 = vld [vmem:[%s1394_s25 + $0x40] sm:$0xff]   ;;  %v1308_v11 = vld [vmem:[%s1394_s25 + $0x48] sm:$0xff]   ;;  %v1309_v13 = vld [vmem:[%s1394_s25 + $0x50] sm:$0xff]  }
  0x13   : > { %1235 = vmatprep.mubr.bf16.mxu1 %v1307_v7  ;;  %v1302_v14 = vld [vmem:[%s1394_s25 + $0x18] sm:$0xff]   ;;  %v1303_v16 = vld [vmem:[%s1394_s25 + $0x20] sm:$0xff]   ;;  %v1304_v18 = vld [vmem:[%s1394_s25 + $0x28] sm:$0xff]  }
  0x14   : > { %1210 = vmatpush3.bf16.msra.mxu0 %v1294_v3  ;;  %1262 = vmatpush3.bf16.msra.mxu1 %v1294_v3  ;;  %v1310_v15 = vld [vmem:[%s1394_s25 + $0x58] sm:$0xff]   ;;  %v1311_v17 = vld [vmem:[%s1394_s25 + $0x60] sm:$0xff]   ;;  %v1312_v19 = vld [vmem:[%s1394_s25 + $0x68] sm:$0xff]  }
  0x15   : > { %1211 = vmatprep.subr.bf16.mxu0 %v1295_v5  ;;  %1255 = vmatprep.subr.bf16.mxu1 %v1295_v5  ;;  %v1305_v20 = vld [vmem:[%s1394_s25 + $0x30] sm:$0xff]   ;;  %v1306_v22 = vld [vmem:[%s1394_s25 + $0x38] sm:$0xff]  }
  0x16   : > { %v1313_v21 = vld [vmem:[%s1394_s25 + $0x70] sm:$0xff]   ;;  %v1314_v23 = vld [vmem:[%s1394_s25 + $0x78] sm:$0xff]  }
  0x18   : > { %1212 = vmatpush3.bf16.msra.mxu0 %v1295_v5  ;;  %1263 = vmatpush3.bf16.msra.mxu1 %v1295_v5 }
  0x19   : > { %1213 = vmatprep.subr.bf16.mxu0 %v1296_v6  ;;  %1256 = vmatprep.subr.bf16.mxu1 %v1296_v6 }
  0x1c   : > { %1214 = vmatpush3.bf16.msra.mxu0 %v1296_v6  ;;  %1264 = vmatpush3.bf16.msra.mxu1 %v1296_v6 }
  0x1d   : > { %1215 = vmatprep.subr.bf16.mxu0 %v1297_v8  ;;  %1257 = vmatprep.subr.bf16.mxu1 %v1297_v8 }
  0x20   : > { %1216 = vmatpush3.bf16.msra.mxu0 %v1297_v8  ;;  %1265 = vmatpush3.bf16.msra.mxu1 %v1297_v8 }
  0x21   : > { %1217 = vmatprep.subr.bf16.mxu0 %v1298_v9  ;;  %1258 = vmatprep.subr.bf16.mxu1 %v1298_v9 }
  0x24   : > { %1218 = vmatpush3.bf16.msra.mxu0 %v1298_v9  ;;  %1266 = vmatpush3.bf16.msra.mxu1 %v1298_v9 }
  0x27   : > { %1220 = vmatmul.mubr.bf16.vlgmr.msra.gmra.mrb[0].mxu0 %v1300_v10  ;;  %1236 = vmatmul.mubr.bf16.vlgmr.msra.gmra.mrb[0].mxu1 %v1308_v11 }
  0x28   : > { %1223 = vmatprep.mubr.bf16.mxu0 %v1301_v12  ;;  %1239 = vmatprep.mubr.bf16.mxu1 %v1309_v13 }
  0x2f   : > { %1224 = vmatmul.mubr.bf16.gmra.mrb[4].mxu0 %v1302_v14  ;;  %1240 = vmatmul.mubr.bf16.gmra.mrb[4].mxu1 %v1310_v15 }
  0x30   : > { %1227 = vmatprep.mubr.bf16.mxu0 %v1303_v16  ;;  %1243 = vmatprep.mubr.bf16.mxu1 %v1311_v17 }
  0x37   : > { %1228 = vmatmul.mubr.bf16.gmra.mrb[8].mxu0 %v1304_v18  ;;  %1244 = vmatmul.mubr.bf16.gmra.mrb[8].mxu1 %v1312_v19 }
  0x38   : > { %1231 = vmatprep.mubr.bf16.mxu0 %v1305_v20  ;;  %1247 = vmatprep.mubr.bf16.mxu1 %v1313_v21 }
  0x3f   : > { %1232 = vmatmul.mubr.bf16.gmra.mrb[12].mxu0 %v1306_v22  ;;  %1248 = vmatmul.mubr.bf16.gmra.mrb[12].mxu1 %v1314_v23 }
  0xfa   : > { %v1221_v24 = vpop.f32.mrb[0].mxu0  ;;  %v1427_v25 = vpop.f32.mrb[0].mxu1 }
  0xfb   : > { %v456_v26 = vpop.f32.mrb[1].mxu0  ;;  %v1429_v27 = vpop.f32.mrb[1].mxu1  ;;  %v782_v39 = vmul.f32 %v1221_v24, %v1221_v24 }
  0xfc   : > { %v1222_v28 = vpop.f32.mrb[2].mxu0  ;;  %v1438_v29 = vpop.f32.mrb[2].mxu1  ;;  %v780_v30 = vmul.f32 %v456_v26, %v456_v26 }
  0xfd   : > { %v1092_v31 = vpack.c.bf16 %v1222_v28, %v1221_v24  ;;  %v459_v32 = vpop.f32.mrb[3].mxu0  ;;  %v1132_v33 = vpack.c.bf16 %v1438_v29, %v1427_v25  ;;  %v1442_v34 = vpop.f32.mrb[3].mxu1  ;;  %v783_v42 = vmul.f32 %v1222_v28, %v1222_v28 }
  0xfe   : > { %v1087_v35 = vpack.c.bf16 %v459_v32, %v456_v26  ;;  %v743_v36 = vadd.f32 %v459_v32, %v456_v26  ;;  %v781_v37 = vmul.f32 %v459_v32, %v459_v32  ;;  %v1127_v38 = vpack.c.bf16 %v1442_v34, %v1429_v27 }
  0xff   : > { %1164 = vst [vmem:[%s1436_s11 + $0x8] sm:$0xff] %v1092_v31   ;;  %1172 = vst [vmem:[%s1436_s11 + $0x48] sm:$0xff] %v1132_v33  }
 0x100   : > { %1088 = vst [vmem:[%s1436_s11] sm:$0xff] %v1087_v35   ;;  %v744_v40 = vadd.f32 %v1221_v24, %v743_v36  ;;  %v812_v41 = vadd.f32 %v781_v37, %v780_v30  ;;  %1171 = vst [vmem:[%s1436_s11 + $0x40] sm:$0xff] %v1127_v38  }
 0x102   : > { %v813_v43 = vadd.f32 %v812_v41, %v782_v39  ;;  %v1225_v44 = vpop.f32.mrb[4].mxu0  ;;  %v745_v45 = vadd.f32 %v1222_v28, %v744_v40  ;;  %v1450_v46 = vpop.f32.mrb[4].mxu1 }
 0x103   : > { %v472_v47 = vpop.f32.mrb[5].mxu0  ;;  %v1452_v48 = vpop.f32.mrb[5].mxu1  ;;  %v786_v63 = vmul.f32 %v1225_v44, %v1225_v44 }
 0x104   : > { %v746_v49 = vadd.f32 %v745_v45, %v472_v47  ;;  %v784_v50 = vmul.f32 %v472_v47, %v472_v47  ;;  %v814_v51 = vadd.f32 %v813_v43, %v783_v42  ;;  %v1226_v52 = vpop.f32.mrb[6].mxu0  ;;  %v1454_v53 = vpop.f32.mrb[6].mxu1 }
 0x105   : > { %v1102_v54 = vpack.c.bf16 %v1226_v52, %v1225_v44  ;;  %v475_v55 = vpop.f32.mrb[7].mxu0  ;;  %v1142_v56 = vpack.c.bf16 %v1454_v53, %v1450_v46  ;;  %v1458_v57 = vpop.f32.mrb[7].mxu1  ;;  %v787_v2 = vmul.f32 %v1226_v52, %v1226_v52 }
 0x106   : > { %v815_v58 = vadd.f32 %v814_v51, %v784_v50  ;;  %v1097_v59 = vpack.c.bf16 %v475_v55, %v472_v47  ;;  %v747_v60 = vadd.f32 %v746_v49, %v475_v55  ;;  %v785_v61 = vmul.f32 %v475_v55, %v475_v55 }
 0x107   : > { %1166 = vst [vmem:[%s1436_s11 + $0x18] sm:$0xff] %v1102_v54   ;;  %1174 = vst [vmem:[%s1436_s11 + $0x58] sm:$0xff] %v1142_v56   ;;  %v1137_v62 = vpack.c.bf16 %v1458_v57, %v1452_v48 }
 0x108   : > { %1165 = vst [vmem:[%s1436_s11 + $0x10] sm:$0xff] %v1097_v59   ;;  %v748_v0 = vadd.f32 %v1225_v44, %v747_v60  ;;  %v816_v1 = vadd.f32 %v815_v58, %v785_v61  ;;  %v796_v61 = vmul.f32 %v1429_v27, %v1429_v27 }
 0x109   : > { %1173 = vst [vmem:[%s1436_s11 + $0x50] sm:$0xff] %v1137_v62  }
 0x10a   : > { %v817_v3 = vadd.f32 %v816_v1, %v786_v63  ;;  %v1229_v4 = vpop.f32.mrb[8].mxu0  ;;  %v749_v5 = vadd.f32 %v1226_v52, %v748_v0  ;;  %v1466_v6 = vpop.f32.mrb[8].mxu1 }
 0x10b   : > { %v488_v7 = vpop.f32.mrb[9].mxu0  ;;  %v1468_v8 = vpop.f32.mrb[9].mxu1  ;;  %v790_v23 = vmul.f32 %v1229_v4, %v1229_v4 }
 0x10c   : > { %v750_v9 = vadd.f32 %v749_v5, %v488_v7  ;;  %v788_v10 = vmul.f32 %v488_v7, %v488_v7  ;;  %v818_v11 = vadd.f32 %v817_v3, %v787_v2  ;;  %v1230_v12 = vpop.f32.mrb[10].mxu0  ;;  %v1470_v13 = vpop.f32.mrb[10].mxu1  ;;  %v797_v2 = vmul.f32 %v1442_v34, %v1442_v34 }
 0x10d   : > { %v1112_v14 = vpack.c.bf16 %v1230_v12, %v1229_v4  ;;  %v491_v15 = vpop.f32.mrb[11].mxu0  ;;  %v1152_v16 = vpack.c.bf16 %v1470_v13, %v1466_v6  ;;  %v1474_v17 = vpop.f32.mrb[11].mxu1  ;;  %v791_v28 = vmul.f32 %v1230_v12, %v1230_v12  ;;  %v798_v3 = vmul.f32 %v1427_v25, %v1427_v25 }
 0x10e   : > { %v819_v18 = vadd.f32 %v818_v11, %v788_v10  ;;  %v1107_v19 = vpack.c.bf16 %v491_v15, %v488_v7  ;;  %v751_v20 = vadd.f32 %v750_v9, %v491_v15  ;;  %v789_v21 = vmul.f32 %v491_v15, %v491_v15 }
 0x10f   : > { %1168 = vst [vmem:[%s1436_s11 + $0x28] sm:$0xff] %v1112_v14   ;;  %1176 = vst [vmem:[%s1436_s11 + $0x68] sm:$0xff] %v1152_v16   ;;  %v1147_v22 = vpack.c.bf16 %v1474_v17, %v1468_v8  ;;  %v799_v7 = vmul.f32 %v1438_v29, %v1438_v29  ;;  %v801_v15 = vmul.f32 %v1458_v57, %v1458_v57 }
 0x110   : > { %1167 = vst [vmem:[%s1436_s11 + $0x20] sm:$0xff] %v1107_v19   ;;  %v752_v24 = vadd.f32 %v1229_v4, %v751_v20  ;;  %v820_v26 = vadd.f32 %v819_v18, %v789_v21 }
 0x111   : > { %1175 = vst [vmem:[%s1436_s11 + $0x60] sm:$0xff] %v1147_v22  }
 0x112   : > { %v821_v30 = vadd.f32 %v820_v26, %v790_v23  ;;  %v1233_v31 = vpop.f32.mrb[12].mxu0  ;;  %v753_v32 = vadd.f32 %v1230_v12, %v752_v24  ;;  %v1482_v33 = vpop.f32.mrb[12].mxu1  ;;  %v805_v24 = vmul.f32 %v1474_v17, %v1474_v17 }
 0x113   : > { %v504_v35 = vpop.f32.mrb[13].mxu0  ;;  %v568_v36 = vpop.f32.mrb[13].mxu1  ;;  %v794_v54 = vmul.f32 %v1233_v31, %v1233_v31 }
 0x114   : > { %v754_v37 = vadd.f32 %v753_v32, %v504_v35  ;;  %v792_v38 = vmul.f32 %v504_v35, %v504_v35  ;;  %v822_v39 = vadd.f32 %v821_v30, %v791_v28  ;;  %v1234_v40 = vpop.f32.mrb[14].mxu0  ;;  %v1484_v41 = vpop.f32.mrb[14].mxu1 }
 0x115   : > { %v1122_v42 = vpack.c.bf16 %v1234_v40, %v1233_v31  ;;  %v507_v43 = vpop.f32.mrb[15].mxu0  ;;  %v1162_v44 = vpack.c.bf16 %v1484_v41, %v1482_v33  ;;  %v571_v45 = vpop.f32.mrb[15].mxu1  ;;  %v795_v58 = vmul.f32 %v1234_v40, %v1234_v40 }
 0x116   : > { %v823_v47 = vadd.f32 %v822_v39, %v792_v38  ;;  %v1117_v49 = vpack.c.bf16 %v507_v43, %v504_v35  ;;  %v755_v50 = vadd.f32 %v754_v37, %v507_v43  ;;  %v793_v51 = vmul.f32 %v507_v43, %v507_v43 }
 0x117   : > { %1170 = vst [vmem:[%s1436_s11 + $0x38] sm:$0xff] %v1122_v42   ;;  %1178 = vst [vmem:[%s1436_s11 + $0x78] sm:$0xff] %v1162_v44   ;;  %v1157_v52 = vpack.c.bf16 %v571_v45, %v568_v36  ;;  %v809_v39 = vmul.f32 %v571_v45, %v571_v45  ;;  %v811_v42 = vmul.f32 %v1484_v41, %v1484_v41 }
 0x118   : > { %1169 = vst [vmem:[%s1436_s11 + $0x30] sm:$0xff] %v1117_v49   ;;  %v756_v55 = vadd.f32 %v1233_v31, %v755_v50  ;;  %v824_v56 = vadd.f32 %v823_v47, %v793_v51 }
 0x119   : > { %1177 = vst [vmem:[%s1436_s11 + $0x70] sm:$0xff] %v1157_v52  }
 0x11a   : > { %v825_v59 = vadd.f32 %v824_v56, %v794_v54  ;;  %v757_v60 = vadd.f32 %v1234_v40, %v756_v55 }
 0x11c   : > { %v758_v62 = vadd.f32 %v757_v60, %v1429_v27  ;;  %v826_v63 = vadd.f32 %v825_v59, %v795_v58  ;;  %v800_v27 = vmul.f32 %v1452_v48, %v1452_v48 }
 0x11e   : > { %v827_v0 = vadd.f32 %v826_v63, %v796_v61  ;;  %v759_v1 = vadd.f32 %v758_v62, %v1442_v34 }
 0x120   : > { %v760_v4 = vadd.f32 %v1427_v25, %v759_v1  ;;  %v828_v5 = vadd.f32 %v827_v0, %v797_v2  ;;  %v802_v25 = vmul.f32 %v1450_v46, %v1450_v46 }
 0x122   : > { %v829_v9 = vadd.f32 %v828_v5, %v798_v3  ;;  %v761_v10 = vadd.f32 %v1438_v29, %v760_v4  ;;  %v803_v29 = vmul.f32 %v1454_v53, %v1454_v53 }
 0x124   : > { %v762_v11 = vadd.f32 %v761_v10, %v1452_v48  ;;  %v830_v12 = vadd.f32 %v829_v9, %v799_v7  ;;  %v804_v48 = vmul.f32 %v1468_v8, %v1468_v8 }
 0x126   : > { %v831_v14 = vadd.f32 %v830_v12, %v800_v27  ;;  %v763_v34 = vadd.f32 %v762_v11, %v1458_v57 }
 0x128   : > { %v764_v16 = vadd.f32 %v1450_v46, %v763_v34  ;;  %v832_v18 = vadd.f32 %v831_v14, %v801_v15  ;;  %v806_v46 = vmul.f32 %v1466_v6, %v1466_v6 }
 0x12a   : > { %v833_v19 = vadd.f32 %v832_v18, %v802_v25  ;;  %v765_v20 = vadd.f32 %v1454_v53, %v764_v16  ;;  %v807_v53 = vmul.f32 %v1470_v13, %v1470_v13 }
 0x12c   : > { %v766_v21 = vadd.f32 %v765_v20, %v1468_v8  ;;  %v834_v22 = vadd.f32 %v833_v19, %v803_v29  ;;  %v808_v8 = vmul.f32 %v568_v36, %v568_v36 }
 0x12e   : > { %v835_v23 = vadd.f32 %v834_v22, %v804_v48  ;;  %v767_v57 = vadd.f32 %v766_v21, %v1474_v17  ;;  %v810_v17 = vmul.f32 %v1482_v33, %v1482_v33 }
 0x130   : > { %v768_v26 = vadd.f32 %v1466_v6, %v767_v57  ;;  %v836_v28 = vadd.f32 %v835_v23, %v805_v24 }
 0x132   : > { %v837_v30 = vadd.f32 %v836_v28, %v806_v46  ;;  %v769_v31 = vadd.f32 %v1470_v13, %v768_v26 }
 0x134   : > { %v770_v32 = vadd.f32 %v769_v31, %v568_v36  ;;  %v838_v35 = vadd.f32 %v837_v30, %v807_v53 }
 0x136   : > { %v839_v37 = vadd.f32 %v838_v35, %v808_v8  ;;  %v771_v38 = vadd.f32 %v770_v32, %v571_v45 }
 0x138   : > { %v772_v40 = vadd.f32 %v1482_v33, %v771_v38  ;;  %v840_v6 = vadd.f32 %v839_v37, %v809_v39 }
 0x13a   : > { %v773_v43 = vadd.f32 %v1484_v41, %v772_v40  ;;  %v841_v44 = vadd.f32 %v840_v6, %v810_v17 }
 0x13c   : > { %v774_v13 = vrot.slane %v773_v43, 4  ;;  %v842_v47 = vadd.f32 %v841_v44, %v811_v42 }
 0x13e   : > { %v775_v36 = vadd.f32 %v774_v13, %v773_v43  ;;  %v843_v49 = vrot.slane %v842_v47, 4 }
 0x140   : > { %v776_v50 = vrot.slane %v775_v36, 2  ;;  %v844_v51 = vadd.f32 %v843_v49, %v842_v47 }
 0x142   : > { %v777_v45 = vadd.f32 %v776_v50, %v775_v36  ;;  %v845_v52 = vrot.slane %v844_v51, 2 }
 0x144   : > { %v778_v54 = vrot.slane %v777_v45, 1  ;;  %v846_v55 = vadd.f32 %v845_v52, %v844_v51 }
 0x146   : > { %v847_v56 = vrot.slane %v846_v55, 1  ;;  %v779_v33 = vadd.f32 %v778_v54, %v777_v45 }
 0x148   : > { %v848_v58 = vadd.f32 %v847_v56, %v846_v55 }
 0x14a   : > { %v850_v41 = vsel %vm849_vm0, %v779_v33, %v848_v58 }
 0x14b   : > { %v852_v59 = vsel %vm851_vm1, %v850_v41, 0.0 }
 0x14c   : > { %853 = vst [vmem:[%s228_s19] sm:$0xff] %v852_v59 }
 0x14d PF: > { %s14_s14 = sadd.s32 1, %s1337_s14   ;;  %s1551_s12 = smov %s1333_s13 }
 0x14e   : > { %p11_p5 = scmp.ge.s32.totalorder %s14_s14, 4   ;;  %s1552_s13 = smov %s1554_s15 }
 0x150   :  { %13 = sbr.rel (!%p11_p5) target bundleno = 2 (0x2), region = 70 }

</bundles_post_ra>
